<compile_context>
chip_gen: v6e
topology: v6e:2x2x1
jax: 0.10.0
libtpu: 0.0.40
codegen_flags: <defaults>
</compile_context>

<pallas_src>
import jax
import jax.numpy as jnp
import numpy as np
from jax.experimental import pallas as pl
from jax.experimental.pallas import tpu as pltpu


def _round_up(x, m):
    return ((x + m - 1) // m) * m


def mlp_kernel(x_ref, w1_ref, b1_ref, w2_ref, b2_ref, o_ref):
    # Layer 1 on the VPU: h = relu(x @ w1 + b1) with K = 4 unrolled as
    # broadcast-FMAs (avoids an MXU pass padded 4 -> 128/256).
    x = x_ref[...]                         # (TB, 4)   f32
    w1 = w1_ref[...]                       # (4, Hp)   f32
    h = jnp.broadcast_to(b1_ref[...], (x.shape[0], w1.shape[1]))  # (TB, Hp)
    for k in range(x.shape[1]):            # static unroll over K = 4
        h = h + x[:, k:k + 1] * w1[k:k + 1, :]
    h = jnp.maximum(h, 0.0)                # ReLU

    # Layer 2 on the MXU: (TB, Hp) @ (Hp, TN), f32 accumulation.
    out = jnp.dot(h, w2_ref[...], preferred_element_type=jnp.float32)
    out = out + b2_ref[...]
    o_ref[...] = out.astype(o_ref.dtype)


def generator_forward(x, w1, b1, w2, b2):
    """x: (B, 4) f32; w1: (4, H); b1: (1, H); w2: (H, O); b2: (1, O).
    Returns (B, O) f32 == relu(x @ w1 + b1) @ w2 + b2 (PyTorch semantics)."""
    B, in_features = x.shape
    hidden = w1.shape[1]
    out_size = w2.shape[1]

    # --- tile sizes (lane-dense, sublane-aligned) ---
    if B >= 256:
        TB = 256
        Bp = _round_up(B, TB)
    else:
        Bp = _round_up(B, 8)
        TB = Bp
    TN = 512 if out_size >= 512 else 128
    Op = _round_up(out_size, TN)
    Hp = _round_up(hidden, 128)
    # TODO(synk): for very large hidden (Hp*TN*4*2 approaching VMEM limits),
    # additionally tile the contraction axis with an accumulator.

    # --- zero padding (numerically a no-op; pad rows/cols sliced off below) ---
    xp = jnp.pad(x, ((0, Bp - B), (0, 0)))
    w1p = jnp.pad(w1, ((0, 0), (0, Hp - hidden)))
    b1p = jnp.pad(b1, ((0, 0), (0, Hp - hidden)))
    w2p = jnp.pad(w2, ((0, Hp - hidden), (0, Op - out_size)))
    b2p = jnp.pad(b2, ((0, 0), (0, Op - out_size)))

    grid = (Bp // TB, Op // TN)            # out axis innermost

    out_p = pl.pallas_call(
        mlp_kernel,
        out_shape=jax.ShapeDtypeStruct((Bp, Op), jnp.float32),
        grid=grid,
        in_specs=[
            pl.BlockSpec((TB, in_features), lambda i, j: (i, 0)),  # x: resident over j
            pl.BlockSpec((in_features, Hp), lambda i, j: (0, 0)),  # w1: resident
            pl.BlockSpec((1, Hp), lambda i, j: (0, 0)),            # b1: resident
            pl.BlockSpec((Hp, TN), lambda i, j: (0, j)),           # w2: streamed cols
            pl.BlockSpec((1, TN), lambda i, j: (0, j)),            # b2: streamed cols
        ],
        out_specs=pl.BlockSpec((TB, TN), lambda i, j: (i, j)),
        compiler_params=pltpu.CompilerParams(
            dimension_semantics=("parallel", "parallel")),
    )(xp, w1p, b1p, w2p, b2p)

    return out_p[:B, :out_size]


def init_linear_params(key, fan_in, fan_out):
    """Matches PyTorch nn.Linear default init: U(-1/sqrt(fan_in), +1/sqrt(fan_in)).
    Weight returned as (fan_in, fan_out) so the kernel computes x @ W (equivalent
    to PyTorch's x @ W.T with W stored as (out, in))."""
    kw, kb = jax.random.split(key)
    bound = 1.0 / np.sqrt(fan_in)
    w = jax.random.uniform(kw, (fan_in, fan_out), jnp.float32, -bound, bound)
    b = jax.random.uniform(kb, (1, fan_out), jnp.float32, -bound, bound)
    return w, b


if __name__ == "__main__":
    output_size = 128            # -> hidden = output_size // 4 = 32
    hidden = output_size // 4
    in_features = 4
    batch = 256                  # batch many samples per call to amortize launch cost

    key = jax.random.PRNGKey(0)
    kx, k1, k2 = jax.random.split(key, 3)

    x = jax.random.normal(kx, (batch, in_features), jnp.float32)
    w1, b1 = init_linear_params(k1, in_features, hidden)
    w2, b2 = init_linear_params(k2, hidden, output_size)

    out = generator_forward(x, w1, b1, w2, b2)
    out = jax.block_until_ready(out)

    # Reference check in plain JAX (same semantics as the PyTorch module).
    ref = jnp.maximum(x @ w1 + b1, 0.0) @ w2 + b2
    np.testing.assert_allclose(np.asarray(out), np.asarray(ref), rtol=1e-5, atol=1e-5)

    assert out.shape == (batch, output_size)
    print("KERNEL_OK")
</pallas_src>

<mosaic_0001>
module attributes {stable_mosaic.version = 11 : i64} {
  func.func @mlp_kernel(%arg0: i32, %arg1: i32, %arg2: memref<256x4xf32, #tpu.memory_space<vmem>>, %arg3: memref<4x128xf32, #tpu.memory_space<vmem>>, %arg4: memref<1x128xf32, #tpu.memory_space<vmem>>, %arg5: memref<128x128xf32, #tpu.memory_space<vmem>>, %arg6: memref<1x128xf32, #tpu.memory_space<vmem>>, %arg7: memref<256x128xf32, #tpu.memory_space<vmem>>) attributes {dimension_semantics = [#tpu.dimension_semantics<parallel>, #tpu.dimension_semantics<parallel>], iteration_bounds = array<i64: 1, 1>, scalar_prefetch = 0 : i64, scratch_operands = 0 : i64, tpu.core_type = #tpu.core_type<tc>, window_params = [{transform_indices = @transform_0, window_bounds = array<i64: 256, 4>}, {pipeline_mode = #tpu.pipeline_mode<synchronous>, transform_indices = @transform_1, window_bounds = array<i64: 4, 128>}, {pipeline_mode = #tpu.pipeline_mode<synchronous>, transform_indices = @transform_2, window_bounds = array<i64: 1, 128>}, {transform_indices = @transform_3, window_bounds = array<i64: 128, 128>}, {transform_indices = @transform_4, window_bounds = array<i64: 1, 128>}, {transform_indices = @transform_5, window_bounds = array<i64: 256, 128>}]} {
    %c0 = arith.constant 0 : index
    %c0_0 = arith.constant 0 : index
    %0 = vector.load %arg2[%c0, %c0_0] : memref<256x4xf32, #tpu.memory_space<vmem>>, vector<256x4xf32>
    %c0_1 = arith.constant 0 : index
    %c0_2 = arith.constant 0 : index
    %1 = vector.load %arg3[%c0_1, %c0_2] : memref<4x128xf32, #tpu.memory_space<vmem>>, vector<4x128xf32>
    %c0_3 = arith.constant 0 : index
    %c0_4 = arith.constant 0 : index
    %2 = vector.load %arg4[%c0_3, %c0_4] : memref<1x128xf32, #tpu.memory_space<vmem>>, vector<1x128xf32>
    %3 = vector.shape_cast %2 : vector<1x128xf32> to vector<1x128xf32>
    %4 = vector.broadcast %3 : vector<1x128xf32> to vector<256x128xf32>
    %5 = vector.extract_strided_slice %0 {offsets = [0, 0], sizes = [256, 1], strides = [1, 1]} : vector<256x4xf32> to vector<256x1xf32>
    %6 = vector.extract_strided_slice %1 {offsets = [0, 0], sizes = [1, 128], strides = [1, 1]} : vector<4x128xf32> to vector<1x128xf32>
    %7 = vector.broadcast %5 : vector<256x1xf32> to vector<256x128xf32>
    %8 = vector.broadcast %6 : vector<1x128xf32> to vector<256x128xf32>
    %9 = arith.mulf %7, %8 : vector<256x128xf32>
    %10 = arith.addf %4, %9 : vector<256x128xf32>
    %11 = vector.extract_strided_slice %0 {offsets = [0, 1], sizes = [256, 1], strides = [1, 1]} : vector<256x4xf32> to vector<256x1xf32>
    %12 = vector.extract_strided_slice %1 {offsets = [1, 0], sizes = [1, 128], strides = [1, 1]} : vector<4x128xf32> to vector<1x128xf32>
    %13 = vector.broadcast %11 : vector<256x1xf32> to vector<256x128xf32>
    %14 = vector.broadcast %12 : vector<1x128xf32> to vector<256x128xf32>
    %15 = arith.mulf %13, %14 : vector<256x128xf32>
    %16 = arith.addf %10, %15 : vector<256x128xf32>
    %17 = vector.extract_strided_slice %0 {offsets = [0, 2], sizes = [256, 1], strides = [1, 1]} : vector<256x4xf32> to vector<256x1xf32>
    %18 = vector.extract_strided_slice %1 {offsets = [2, 0], sizes = [1, 128], strides = [1, 1]} : vector<4x128xf32> to vector<1x128xf32>
    %19 = vector.broadcast %17 : vector<256x1xf32> to vector<256x128xf32>
    %20 = vector.broadcast %18 : vector<1x128xf32> to vector<256x128xf32>
    %21 = arith.mulf %19, %20 : vector<256x128xf32>
    %22 = arith.addf %16, %21 : vector<256x128xf32>
    %23 = vector.extract_strided_slice %0 {offsets = [0, 3], sizes = [256, 1], strides = [1, 1]} : vector<256x4xf32> to vector<256x1xf32>
    %24 = vector.extract_strided_slice %1 {offsets = [3, 0], sizes = [1, 128], strides = [1, 1]} : vector<4x128xf32> to vector<1x128xf32>
    %25 = vector.broadcast %23 : vector<256x1xf32> to vector<256x128xf32>
    %26 = vector.broadcast %24 : vector<1x128xf32> to vector<256x128xf32>
    %27 = arith.mulf %25, %26 : vector<256x128xf32>
    %28 = arith.addf %22, %27 : vector<256x128xf32>
    %cst = arith.constant 0.000000e+00 : f32
    %29 = vector.broadcast %cst : f32 to vector<256x128xf32>
    %30 = arith.maximumf %28, %29 : vector<256x128xf32>
    %c0_5 = arith.constant 0 : index
    %c0_6 = arith.constant 0 : index
    %31 = vector.load %arg5[%c0_5, %c0_6] : memref<128x128xf32, #tpu.memory_space<vmem>>, vector<128x128xf32>
    %cst_7 = arith.constant dense<0.000000e+00> : vector<256x128xf32>
    %32 = tpu.matmul %30, %31, %cst_7 {dimension_numbers = #tpu.dot_dimension_numbers<[1], [0], [0], [1], [0, 0, 1, 1], [], []>} : vector<256x128xf32>, vector<128x128xf32>, vector<256x128xf32> -> vector<256x128xf32>
    %c0_8 = arith.constant 0 : index
    %c0_9 = arith.constant 0 : index
    %33 = vector.load %arg6[%c0_8, %c0_9] : memref<1x128xf32, #tpu.memory_space<vmem>>, vector<1x128xf32>
    %34 = vector.broadcast %33 : vector<1x128xf32> to vector<256x128xf32>
    %35 = arith.addf %32, %34 : vector<256x128xf32>
    %c0_10 = arith.constant 0 : index
    %c0_11 = arith.constant 0 : index
    %36 = vector.load %arg7[%c0_10, %c0_11] : memref<256x128xf32, #tpu.memory_space<vmem>>, vector<256x128xf32>
    tpu.vector_store %arg7[%c0_10, %c0_11], %35 {strides = array<i32>} : memref<256x128xf32, #tpu.memory_space<vmem>>, vector<256x128xf32>,
    return
  }
  func.func @transform_0(%arg0: i32, %arg1: i32) -> (i32, i32) {
    %c0_i32 = arith.constant 0 : i32
    %c0_i32_0 = arith.constant 0 : i32
    return %arg0, %c0_i32 : i32, i32
  }
  func.func @transform_1(%arg0: i32, %arg1: i32) -> (i32, i32) {
    %c0_i32 = arith.constant 0 : i32
    %c0_i32_0 = arith.constant 0 : i32
    %c0_i32_1 = arith.constant 0 : i32
    return %c0_i32, %c0_i32_0 : i32, i32
  }
  func.func @transform_2(%arg0: i32, %arg1: i32) -> (i32, i32) {
    %c0_i32 = arith.constant 0 : i32
    %c0_i32_0 = arith.constant 0 : i32
    %c0_i32_1 = arith.constant 0 : i32
    return %c0_i32, %c0_i32_0 : i32, i32
  }
  func.func @transform_3(%arg0: i32, %arg1: i32) -> (i32, i32) {
    %c0_i32 = arith.constant 0 : i32
    %c0_i32_0 = arith.constant 0 : i32
    return %c0_i32, %arg1 : i32, i32
  }
  func.func @transform_4(%arg0: i32, %arg1: i32) -> (i32, i32) {
    %c0_i32 = arith.constant 0 : i32
    %c0_i32_0 = arith.constant 0 : i32
    return %c0_i32, %arg1 : i32, i32
  }
  func.func @transform_5(%arg0: i32, %arg1: i32) -> (i32, i32) {
    %c0_i32 = arith.constant 0 : i32
    return %arg0, %arg1 : i32, i32
  }
}

</mosaic_0001>

<bundles_post_ra>
// kernel: tpu_custom_call.1
= control target key start
LH: loop header
LB: loop body
LE: loop exit
PB: predicated region body
PF: predicated region fallthrough
CT: control target
= control target key end

     0   :  { %v1433_v2 = vmov 0   ;;  %s2301_s0 = inlined_call_operand.vmem [shape: f32[256,4], index: 0, kind: input, shape index: {}]   ;;  %s2302_s1 = inlined_call_operand.vmem [shape: f32[4,128], index: 1, kind: input, shape index: {}]   ;;  %s2303_s2 = inlined_call_operand.vmem [shape: f32[1,128], index: 2, kind: input, shape index: {}]   ;;  %s2304_s3 = inlined_call_operand.vmem [shape: f32[128,128], index: 3, kind: input, shape index: {}]   ;;  %s2305_s4 = inlined_call_operand.vmem [shape: f32[1,128], index: 4, kind: input, shape index: {}]   ;;  %s2306_s5 = inlined_call_operand.hbm [shape: f32[256,128], index: 5, kind: output, shape index: {}]  }
   0x1   :  { %v1473_v0 = vld [vmem:[%s2301_s0 + $0x10] sm:$0xff]  ;;  %v1478_v1 = vld [vmem:[%s2301_s0] sm:$0xff]  ;;  %1375 = vset.pattern.permute.xlu1 %v1433_v2  ;;  %1374 = vset.pattern.permute.xlu0 %v1433_v2  ;;  %v1485_v3 = vld [vmem:[%s2301_s0 + $0x18] sm:$0xff] }
   0x2   :  { %73 = vperm.xlu1 %1375, %v1473_v0   ;;  %63 = vperm.xlu0 %1374, %v1478_v1   ;;  %v1490_v4 = vld [vmem:[%s2301_s0 + $0x8] sm:$0xff]  ;;  %v1502_v6 = vld [vmem:[%s2301_s0 + $0x20] sm:$0xff]  ;;  %v1509_v7 = vld [vmem:[%s2301_s0 + $0x38] sm:$0xff] }
   0x3   :  { %v1497_v5 = vld [vmem:[%s2301_s0 + $0x28] sm:$0xff]  ;;  %v1514_v8 = vld [vmem:[%s2301_s0 + $0x30] sm:$0xff] }
   0x6   :  { %78 = vperm.xlu1 %1375, %v1485_v3   ;;  %68 = vperm.xlu0 %1374, %v1490_v4  }
   0xa   :  { %88 = vperm.xlu1 %1375, %v1497_v5   ;;  %83 = vperm.xlu0 %1374, %v1502_v6  }
   0xb   :  { %10 = vsyncpa [#allocation3], 0  ;;  %v1521_v9 = vld [vmem:[%s2301_s0 + $0x48] sm:$0xff]  ;;  %v1526_v10 = vld [vmem:[%s2301_s0 + $0x40] sm:$0xff]  ;;  %v2311_v33 = vmov 1   ;;  %v2309_v34 = vmov 2   ;;  %v221_v36 = vlaneseq }
   0xc   :  { %v1533_v11 = vld [vmem:[%s2301_s0 + $0x58] sm:$0xff]  ;;  %v1538_v12 = vld [vmem:[%s2301_s0 + $0x50] sm:$0xff]  ;;  %v1545_v13 = vld [vmem:[%s2301_s0 + $0x68] sm:$0xff]  ;;  %v2307_v35 = vmov 3  }
   0xd   :  { %v1550_v14 = vld [vmem:[%s2301_s0 + $0x60] sm:$0xff]  ;;  %v36_v15 = vld [vmem:[%s2301_s0 + $0x78] sm:$0xff]  ;;  %v1560_v16 = vld [vmem:[%s2301_s0 + $0x70] sm:$0xff]  ;;  %v1697_v39 = vshrl.u32 %v221_v36, 7 }
   0xe   :  { %98 = vperm.xlu1 %1375, %v1509_v7   ;;  %93 = vperm.xlu0 %1374, %v1514_v8   ;;  %v1566_v17 = vld [vmem:[%s2301_s0 + $0x88] sm:$0xff]  ;;  %v1571_v18 = vld [vmem:[%s2301_s0 + $0x80] sm:$0xff]  ;;  %v1578_v19 = vld [vmem:[%s2301_s0 + $0x98] sm:$0xff] }
   0xf   :  { %v1583_v20 = vld [vmem:[%s2301_s0 + $0x90] sm:$0xff]  ;;  %v1590_v21 = vld [vmem:[%s2301_s0 + $0xa8] sm:$0xff]  ;;  %v1595_v22 = vld [vmem:[%s2301_s0 + $0xa0] sm:$0xff]  ;;  %v223_v42 = vsub.s32 0, %v1697_v39 }
  0x10   :  { %v1602_v23 = vld [vmem:[%s2301_s0 + $0xb8] sm:$0xff]  ;;  %v1607_v24 = vld [vmem:[%s2301_s0 + $0xb0] sm:$0xff]  ;;  %v1614_v25 = vld [vmem:[%s2301_s0 + $0xc8] sm:$0xff] }
  0x11   :  { %v1619_v26 = vld [vmem:[%s2301_s0 + $0xc0] sm:$0xff]  ;;  %v1626_v27 = vld [vmem:[%s2301_s0 + $0xd8] sm:$0xff]  ;;  %v1631_v28 = vld [vmem:[%s2301_s0 + $0xd0] sm:$0xff] }
  0x12   :  { %108 = vperm.xlu1 %1375, %v1521_v9   ;;  %103 = vperm.xlu0 %1374, %v1526_v10   ;;  %v1638_v29 = vld [vmem:[%s2301_s0 + $0xe8] sm:$0xff]  ;;  %v1643_v30 = vld [vmem:[%s2301_s0 + $0xe0] sm:$0xff]  ;;  %v1650_v31 = vld [vmem:[%s2301_s0 + $0xf8] sm:$0xff] }
  0x13   :  { %v1655_v32 = vld [vmem:[%s2301_s0 + $0xf0] sm:$0xff]  ;;  %v1710_v43 = vld [vmem:[%s2302_s1] sm:$0xf]  ;;  %v924_v52 = vld [vmem:[%s2304_s3 + $0x78] sm:$0xff] }
  0x14   :  { %v1719_v46 = vrot.slane %v1710_v43, %v223_v42  ;;  %v1728_v51 = vld [vmem:[%s2303_s2] ss:$0 sm:$0xff]  ;;  %1255 = vmatprep.subr.mxu0 %v924_v52  ;;  %v923_v57 = vld [vmem:[%s2304_s3 + $0x70] sm:$0xff]  ;;  %1335 = vmatprep.subr.mxu1 %v924_v52  ;;  %v922_v60 = vld [vmem:[%s2304_s3 + $0x68] sm:$0xff] }
  0x15   :  { %1256 = vmatpush3.msra.mxu0 %v924_v52  ;;  %1351 = vmatpush3.msra.mxu1 %v924_v52  ;;  %v920_v36 = vld [vmem:[%s2304_s3 + $0x58] sm:$0xff]  ;;  %v919_v52 = vld [vmem:[%s2304_s3 + $0x50] sm:$0xff] }
  0x16   :  { %118 = vperm.xlu1 %1375, %v1533_v11   ;;  %113 = vperm.xlu0 %1374, %v1538_v12  }
  0x17   :  { %1257 = vmatprep.subr.mxu0 %v923_v57  ;;  %1336 = vmatprep.subr.mxu1 %v923_v57 }
  0x18   :  { %1258 = vmatpush3.msra.mxu0 %v923_v57  ;;  %1352 = vmatpush3.msra.mxu1 %v923_v57  ;;  %v918_v57 = vld [vmem:[%s2304_s3 + $0x48] sm:$0xff] }
  0x19   :  { %1259 = vmatprep.subr.mxu0 %v922_v60  ;;  %1337 = vmatprep.subr.mxu1 %v922_v60 }
  0x1a   :  { %128 = vperm.xlu1 %1375, %v1545_v13   ;;  %123 = vperm.xlu0 %1374, %v1550_v14  }
  0x1b   :  { %1260 = vmatpush3.msra.mxu0 %v922_v60  ;;  %1353 = vmatpush3.msra.mxu1 %v922_v60 }
  0x1e   :  { %138 = vperm.xlu1 %1375, %v36_v15   ;;  %133 = vperm.xlu0 %1374, %v1560_v16  }
  0x22   :  { %148 = vperm.xlu1 %1375, %v1566_v17   ;;  %143 = vperm.xlu0 %1374, %v1571_v18  }
  0x26   :  { %158 = vperm.xlu1 %1375, %v1578_v19   ;;  %153 = vperm.xlu0 %1374, %v1583_v20  }
  0x2a   :  { %168 = vperm.xlu1 %1375, %v1590_v21   ;;  %163 = vperm.xlu0 %1374, %v1595_v22  }
  0x2e   :  { %178 = vperm.xlu1 %1375, %v1602_v23   ;;  %173 = vperm.xlu0 %1374, %v1607_v24  }
  0x32   :  { %188 = vperm.xlu1 %1375, %v1614_v25   ;;  %183 = vperm.xlu0 %1374, %v1619_v26  }
  0x36   :  { %198 = vperm.xlu1 %1375, %v1626_v27   ;;  %193 = vperm.xlu0 %1374, %v1631_v28  }
  0x3a   :  { %208 = vperm.xlu1 %1375, %v1638_v29   ;;  %203 = vperm.xlu0 %1374, %v1643_v30  }
  0x3e   :  { %218 = vperm.xlu1 %1375, %v1650_v31   ;;  %213 = vperm.xlu0 %1374, %v1655_v32  }
  0x42   :  { %1377 = vset.pattern.permute.xlu1 %v2311_v33  ;;  %1376 = vset.pattern.permute.xlu0 %v2311_v33 }
  0x43   :  { %294 = vperm.xlu1 %1377, %v1490_v4   ;;  %290 = vperm.xlu0 %1376, %v1478_v1  }
  0x47   :  { %298 = vperm.xlu1 %1377, %v1473_v0   ;;  %302 = vperm.xlu0 %1376, %v1485_v3  }
  0x4b   :  { %306 = vperm.xlu1 %1377, %v1502_v6   ;;  %310 = vperm.xlu0 %1376, %v1497_v5  }
  0x4f   :  { %314 = vperm.xlu1 %1377, %v1514_v8   ;;  %318 = vperm.xlu0 %1376, %v1509_v7  }
  0x53   :  { %322 = vperm.xlu1 %1377, %v1526_v10   ;;  %326 = vperm.xlu0 %1376, %v1521_v9  }
  0x57   :  { %330 = vperm.xlu1 %1377, %v1538_v12   ;;  %334 = vperm.xlu0 %1376, %v1533_v11  }
  0x5b   :  { %338 = vperm.xlu1 %1377, %v1550_v14   ;;  %342 = vperm.xlu0 %1376, %v1545_v13  }
  0x5f   :  { %346 = vperm.xlu1 %1377, %v1560_v16   ;;  %350 = vperm.xlu0 %1376, %v36_v15  }
  0x63   :  { %354 = vperm.xlu1 %1377, %v1571_v18   ;;  %358 = vperm.xlu0 %1376, %v1566_v17  }
  0x67   :  { %362 = vperm.xlu1 %1377, %v1583_v20   ;;  %366 = vperm.xlu0 %1376, %v1578_v19  }
  0x6b   :  { %370 = vperm.xlu1 %1377, %v1595_v22   ;;  %374 = vperm.xlu0 %1376, %v1590_v21  }
  0x6f   :  { %1378 = vset.pattern.permute.xlu1 %v2309_v34  ;;  %378 = vperm.xlu0 %1376, %v1607_v24  }
  0x70   :  { %486 = vperm.xlu1 %1378, %v1478_v1  }
  0x73   :  { %382 = vperm.xlu0 %1376, %v1602_v23  }
  0x74   :  { %490 = vperm.xlu1 %1378, %v1490_v4  }
  0x77   :  { %1384 = vset.pattern.permute.xlu0 %v2309_v34 }
  0x78   :  { %554 = vperm.xlu1 %1378, %v1566_v17   ;;  %550 = vperm.xlu0 %1384, %v1571_v18  }
  0x7c   :  { %1379 = vset.pattern.permute.xlu1 %v2307_v35  ;;  %558 = vperm.xlu0 %1384, %v1583_v20  }
  0x7d   :  { %v1692_v37 = vpop.permute.xlu1 %73  ;;  %746 = vperm.xlu1 %1379, %v1571_v18   ;;  %v1695_v38 = vpop.permute.xlu0 %63 }
  0x80   :  { %566 = vperm.xlu0 %1384, %v1595_v22  }
  0x81   :  { %v1700_v40 = vpop.permute.xlu1 %78  ;;  %686 = vperm.xlu1 %1379, %v1490_v4   ;;  %v1703_v41 = vpop.permute.xlu0 %68  ;;  %v921_v4 = vld [vmem:[%s2304_s3 + $0x60] sm:$0xff] }
  0x82   :  { %1261 = vmatprep.subr.mxu0 %v921_v4  ;;  %1338 = vmatprep.subr.mxu1 %v921_v4 }
  0x83   :  { %1262 = vmatpush3.msra.mxu0 %v921_v4  ;;  %1354 = vmatpush3.msra.mxu1 %v921_v4 }
  0x84   :  { %514 = vperm.xlu0 %1384, %v1509_v7   ;;  %1263 = vmatprep.subr.mxu0 %v920_v36 }
  0x85   :  { %v1712_v44 = vpop.permute.xlu1 %88  ;;  %1380 = vset.pattern.permute.xlu1 %v2309_v34  ;;  %v1715_v45 = vpop.permute.xlu0 %83  ;;  %1264 = vmatpush3.msra.mxu0 %v920_v36 }
  0x86   :  { %494 = vperm.xlu1 %1380, %v1473_v0   ;;  %1265 = vmatprep.subr.mxu0 %v919_v52 }
  0x87   :  { %1339 = vmatprep.subr.mxu1 %v920_v36  ;;  %1266 = vmatpush3.msra.mxu0 %v919_v52 }
  0x88   :  { %518 = vperm.xlu0 %1384, %v1526_v10   ;;  %1355 = vmatpush3.msra.mxu1 %v920_v36  ;;  %v916_v36 = vld [vmem:[%s2304_s3 + $0x38] sm:$0xff] }
  0x89   :  { %v99_v47 = vpop.permute.xlu1 %98  ;;  %v94_v48 = vpop.permute.xlu0 %93  ;;  %1267 = vmatprep.subr.mxu0 %v918_v57  ;;  %1340 = vmatprep.subr.mxu1 %v919_v52 }
  0x8a   :  { %v232_v49 = vmul.f32 %v1719_v46, %v99_v47  ;;  %498 = vperm.xlu1 %1380, %v1485_v3   ;;  %v231_v50 = vmul.f32 %v1719_v46, %v94_v48  ;;  %1268 = vmatpush3.msra.mxu0 %v918_v57 }
  0x8b   :  { %1356 = vmatpush3.msra.mxu1 %v919_v52 }
  0x8c   :  { %v1734_v53 = vadd.f32 %v1728_v51, %v232_v49  ;;  %v1737_v54 = vadd.f32 %v1728_v51, %v231_v50  ;;  %586 = vperm.xlu0 %1384, %v1614_v25   ;;  %1341 = vmatprep.subr.mxu1 %v918_v57 }
  0x8d   :  { %v109_v55 = vpop.permute.xlu1 %108  ;;  %v104_v56 = vpop.permute.xlu0 %103  ;;  %1357 = vmatpush3.msra.mxu1 %v918_v57  ;;  %v913_v57 = vld [vmem:[%s2304_s3 + $0x20] sm:$0xff] }
  0x8e   :  { %v234_v58 = vmul.f32 %v1719_v46, %v109_v55  ;;  %562 = vperm.xlu1 %1380, %v1578_v19   ;;  %v233_v59 = vmul.f32 %v1719_v46, %v104_v56 }
  0x90   :  { %v1750_v61 = vadd.f32 %v1728_v51, %v234_v58  ;;  %v1753_v62 = vadd.f32 %v1728_v51, %v233_v59  ;;  %526 = vperm.xlu0 %1384, %v1538_v12  }
  0x91   :  { %v119_v63 = vpop.permute.xlu1 %118  ;;  %v114_v2 = vpop.permute.xlu0 %113 }
  0x92   :  { %v236_v15 = vmul.f32 %v1719_v46, %v119_v63  ;;  %1381 = vset.pattern.permute.xlu1 %v2307_v35  ;;  %v235_v18 = vmul.f32 %v1719_v46, %v114_v2  ;;  %v917_v63 = vld [vmem:[%s2304_s3 + $0x40] sm:$0xff] }
  0x93   :  { %754 = vperm.xlu1 %1381, %v1583_v20   ;;  %1269 = vmatprep.subr.mxu0 %v917_v63 }
  0x94   :  { %v1767_v42 = vadd.f32 %v1728_v51, %v236_v15  ;;  %v1770_v47 = vadd.f32 %v1728_v51, %v235_v18  ;;  %594 = vperm.xlu0 %1384, %v1626_v27   ;;  %1270 = vmatpush3.msra.mxu0 %v917_v63 }
  0x95   :  { %v129_v48 = vpop.permute.xlu1 %128  ;;  %v124_v49 = vpop.permute.xlu0 %123  ;;  %1271 = vmatprep.subr.mxu0 %v916_v36  ;;  %1342 = vmatprep.subr.mxu1 %v917_v63 }
  0x96   :  { %v238_v20 = vmul.f32 %v1719_v46, %v129_v48  ;;  %v237_v50 = vmul.f32 %v1719_v46, %v124_v49  ;;  %v915_v48 = vld [vmem:[%s2304_s3 + $0x30] sm:$0xff]  ;;  %1272 = vmatpush3.msra.mxu0 %v916_v36  ;;  %1358 = vmatpush3.msra.mxu1 %v917_v63 }
  0x97   :  { %694 = vperm.xlu1 %1381, %v1485_v3   ;;  %1273 = vmatprep.subr.mxu0 %v915_v48 }
  0x98   :  { %v1780_v55 = vadd.f32 %v1728_v51, %v238_v20  ;;  %v1783_v56 = vadd.f32 %v1728_v51, %v237_v50  ;;  %534 = vperm.xlu0 %1384, %v1550_v14   ;;  %v914_v50 = vld [vmem:[%s2304_s3 + $0x28] sm:$0xff]  ;;  %1343 = vmatprep.subr.mxu1 %v916_v36 }
  0x99   :  { %v139_v58 = vpop.permute.xlu1 %138  ;;  %v134_v59 = vpop.permute.xlu0 %133  ;;  %1274 = vmatpush3.msra.mxu0 %v915_v48  ;;  %1359 = vmatpush3.msra.mxu1 %v916_v36 }
  0x9a   :  { %v240_v3 = vmul.f32 %v1719_v46, %v139_v58  ;;  %v239_v60 = vmul.f32 %v1719_v46, %v134_v59  ;;  %1275 = vmatprep.subr.mxu0 %v914_v50  ;;  %1344 = vmatprep.subr.mxu1 %v915_v48 }
  0x9b   :  { %1382 = vset.pattern.permute.xlu1 %v2309_v34  ;;  %1276 = vmatpush3.msra.mxu0 %v914_v50 }
  0x9c   :  { %v1796_v2 = vadd.f32 %v1728_v51, %v240_v3  ;;  %v1799_v4 = vadd.f32 %v1728_v51, %v239_v60  ;;  %502 = vperm.xlu1 %1382, %v1502_v6   ;;  %602 = vperm.xlu0 %1384, %v1638_v29   ;;  %v912_v3 = vld [vmem:[%s2304_s3 + $0x18] sm:$0xff] }
  0x9d   :  { %v1803_v15 = vpop.permute.xlu1 %148  ;;  %v1805_v18 = vpop.permute.xlu0 %143  ;;  %1360 = vmatpush3.msra.mxu1 %v915_v48  ;;  %1277 = vmatprep.subr.mxu0 %v913_v57 }
  0x9e   :  { %1345 = vmatprep.subr.mxu1 %v914_v50  ;;  %1278 = vmatpush3.msra.mxu0 %v913_v57 }
  0x9f   :  { %1361 = vmatpush3.msra.mxu1 %v914_v50  ;;  %1279 = vmatprep.subr.mxu0 %v912_v3  ;;  %v910_v50 = vld [vmem:[%s2304_s3 + $0x8] sm:$0xff] }
  0xa0   :  { %506 = vperm.xlu1 %1382, %v1497_v5   ;;  %542 = vperm.xlu0 %1384, %v1560_v16  }
  0xa1   :  { %v1815_v49 = vpop.permute.xlu1 %158  ;;  %v1817_v20 = vpop.permute.xlu0 %153  ;;  %1346 = vmatprep.subr.mxu1 %v913_v57  ;;  %1280 = vmatpush3.msra.mxu0 %v912_v3 }
  0xa2   :  { %1362 = vmatpush3.msra.mxu1 %v913_v57  ;;  %v909_v57 = vld [vmem:[%s2304_s3] sm:$0xff] }
  0xa3   :  { %1347 = vmatprep.subr.mxu1 %v912_v3 }
  0xa4   :  { %570 = vperm.xlu1 %1382, %v1590_v21   ;;  %610 = vperm.xlu0 %1384, %v1650_v31  }
  0xa5   :  { %v1824_v16 = vpop.permute.xlu1 %168  ;;  %v1826_v52 = vpop.permute.xlu0 %163  ;;  %1363 = vmatpush3.msra.mxu1 %v912_v3 }
  0xa8   :  { %1383 = vset.pattern.permute.xlu1 %v2307_v35  ;;  %1406 = vset.pattern.permute.xlu0 %v2307_v35 }
  0xa9   :  { %v179_v58 = vpop.permute.xlu1 %178  ;;  %698 = vperm.xlu1 %1383, %v1502_v6   ;;  %682 = vperm.xlu0 %1406, %v1478_v1   ;;  %v174_v59 = vpop.permute.xlu0 %173  ;;  %v911_v1 = vld [vmem:[%s2304_s3 + $0x10] sm:$0xff] }
  0xaa   :  { %v248_v60 = vmul.f32 %v1719_v46, %v179_v58  ;;  %v247_v63 = vmul.f32 %v1719_v46, %v174_v59  ;;  %1281 = vmatprep.subr.mxu0 %v911_v1  ;;  %1348 = vmatprep.subr.mxu1 %v911_v1 }
  0xab   :  { %1282 = vmatpush3.msra.mxu0 %v911_v1  ;;  %1364 = vmatpush3.msra.mxu1 %v911_v1 }
  0xac   :  { %v1841_v36 = vadd.f32 %v1728_v51, %v248_v60  ;;  %v1844_v6 = vadd.f32 %v1728_v51, %v247_v63  ;;  %1283 = vmatprep.subr.mxu0 %v910_v50  ;;  %1349 = vmatprep.subr.mxu1 %v910_v50 }
  0xad   :  { %v189_v35 = vpop.permute.xlu1 %188  ;;  %762 = vperm.xlu1 %1383, %v1595_v22   ;;  %750 = vperm.xlu0 %1406, %v1566_v17   ;;  %v184_v48 = vpop.permute.xlu0 %183 }
  0xae   :  { %v250_v58 = vmul.f32 %v1719_v46, %v189_v35  ;;  %v249_v59 = vmul.f32 %v1719_v46, %v184_v48  ;;  %1284 = vmatpush3.msra.mxu0 %v910_v50  ;;  %1365 = vmatpush3.msra.mxu1 %v910_v50 }
  0xaf   :  { %1285 = vmatprep.subr.mxu0 %v909_v57  ;;  %1350 = vmatprep.subr.mxu1 %v909_v57 }
  0xb0   :  { %v1857_v60 = vadd.f32 %v1728_v51, %v250_v58  ;;  %v1860_v22 = vadd.f32 %v1728_v51, %v249_v59  ;;  %1286 = vmatpush3.msra.mxu0 %v909_v57  ;;  %1366 = vmatpush3.msra.mxu1 %v909_v57 }
  0xb1   :  { %v199_v17 = vpop.permute.xlu1 %198  ;;  %702 = vperm.xlu1 %1383, %v1497_v5   ;;  %690 = vperm.xlu0 %1406, %v1473_v0   ;;  %v194_v35 = vpop.permute.xlu0 %193 }
  0xb2   :  { %2313 = vst [vmem:[#allocation5_spill] sm:$0xff] %v1857_v60  ;;  %2314 = vst [vmem:[#allocation6_spill] sm:$0xff] %v1860_v22  ;;  %v252_v63 = vmul.f32 %v1719_v46, %v199_v17  ;;  %v251_v48 = vmul.f32 %v1719_v46, %v194_v35 }
  0xb4   :  { %v1870_v58 = vadd.f32 %v1728_v51, %v252_v63  ;;  %v1873_v5 = vadd.f32 %v1728_v51, %v251_v48 }
  0xb5   :  { %v209_v0 = vpop.permute.xlu1 %208  ;;  %1385 = vset.pattern.permute.xlu1 %v2309_v34  ;;  %758 = vperm.xlu0 %1406, %v1578_v19   ;;  %v204_v59 = vpop.permute.xlu0 %203 }
  0xb6   :  { %2315 = vst [vmem:[#allocation7_spill] sm:$0xff] %v1870_v58  ;;  %2316 = vst [vmem:[#allocation8_spill] sm:$0xff] %v1873_v5  ;;  %v254_v17 = vmul.f32 %v1719_v46, %v209_v0  ;;  %510 = vperm.xlu1 %1385, %v1514_v8   ;;  %v253_v3 = vmul.f32 %v1719_v46, %v204_v59 }
  0xb8   :  { %v1881_v35 = vadd.f32 %v1728_v51, %v254_v17  ;;  %v1884_v1 = vadd.f32 %v1728_v51, %v253_v3 }
  0xb9   :  { %v219_v63 = vpop.permute.xlu1 %218  ;;  %766 = vperm.xlu0 %1406, %v1590_v21   ;;  %v214_v19 = vpop.permute.xlu0 %213 }
  0xba   :  { %2317 = vst [vmem:[#allocation9_spill] sm:$0xff] %v1881_v35  ;;  %2318 = vst [vmem:[#allocation10_spill] sm:$0xff] %v1884_v1  ;;  %v256_v48 = vmul.f32 %v1719_v46, %v219_v63  ;;  %574 = vperm.xlu1 %1385, %v1607_v24   ;;  %v255_v0 = vmul.f32 %v1719_v46, %v214_v19  ;;  %v419_v63 = vsub.s32 1, %v1697_v39 }
  0xbc   :  { %v1891_v50 = vadd.f32 %v1728_v51, %v256_v48  ;;  %v1894_v59 = vadd.f32 %v1728_v51, %v255_v0  ;;  %v2321_v48 = vmov 3  }
  0xbd   :  { %706 = vperm.xlu0 %1406, %v1514_v8  }
  0xbe   :  { %2319 = vst [vmem:[#allocation11_spill] sm:$0xff] %v1891_v50  ;;  %2320 = vst [vmem:[#allocation12_spill] sm:$0xff] %v1894_v59  ;;  %v1897_v17 = vpop.permute.xlu1 %294  ;;  %578 = vperm.xlu1 %1385, %v1602_v23   ;;  %v1900_v21 = vpop.permute.xlu0 %290  ;;  %v2322_v59 = vmov 1  }
  0xc1   :  { %710 = vperm.xlu0 %1406, %v1509_v7   ;;  %v1918_v7 = vrot.slane %v1710_v43, %v419_v63 }
  0xc2   :  { %v1903_v57 = vpop.permute.xlu1 %298  ;;  %1386 = vset.pattern.permute.xlu1 %v2311_v33  ;;  %v1906_v3 = vpop.permute.xlu0 %302 }
  0xc3   :  { %386 = vperm.xlu1 %1386, %v1619_v26  }
  0xc5   :  { %714 = vperm.xlu0 %1406, %v1526_v10  }
  0xc6   :  { %v1911_v8 = vpop.permute.xlu1 %306  ;;  %v1913_v19 = vpop.permute.xlu0 %310 }
  0xc7   :  { %1387 = vset.pattern.permute.xlu1 %v2321_v48 }
  0xc8   :  { %770 = vperm.xlu1 %1387, %v1607_v24  }
  0xc9   :  { %718 = vperm.xlu0 %1406, %v1521_v9  }
  0xca   :  { %v1921_v0 = vpop.permute.xlu1 %314  ;;  %v319_v34 = vpop.permute.xlu0 %318 }
  0xcb   :  { %v428_v33 = vmul.f32 %v1918_v7, %v319_v34 }
  0xcc   :  { %1388 = vset.pattern.permute.xlu1 %v2322_v59 }
  0xcd   :  { %v1926_v10 = vadd.f32 %v428_v33, %v1734_v53  ;;  %390 = vperm.xlu1 %1388, %v1614_v25   ;;  %722 = vperm.xlu0 %1406, %v1538_v12  }
  0xce   :  { %v1930_v24 = vpop.permute.xlu1 %322  ;;  %v327_v63 = vpop.permute.xlu0 %326 }
  0xcf   :  { %v430_v50 = vmul.f32 %v1918_v7, %v327_v63 }
  0xd1   :  { %v1934_v1 = vadd.f32 %v430_v50, %v1750_v61  ;;  %1389 = vset.pattern.permute.xlu1 %v2321_v48  ;;  %726 = vperm.xlu0 %1406, %v1533_v11   ;;  %v2325_v61 = vmov 2  }
  0xd2   :  { %v1938_v34 = vpop.permute.xlu1 %330  ;;  %774 = vperm.xlu1 %1389, %v1602_v23   ;;  %v335_v33 = vpop.permute.xlu0 %334 }
  0xd3   :  { %2323 = vst [vmem:[#allocation13_spill] sm:$0xff] %v1934_v1  ;;  %v432_v53 = vmul.f32 %v1918_v7, %v335_v33 }
  0xd5   :  { %v1943_v12 = vadd.f32 %v432_v53, %v1767_v42  ;;  %730 = vperm.xlu0 %1406, %v1550_v14  }
  0xd6   :  { %v1946_v63 = vpop.permute.xlu1 %338  ;;  %1390 = vset.pattern.permute.xlu1 %v2325_v61  ;;  %v343_v50 = vpop.permute.xlu0 %342 }
  0xd7   :  { %2324 = vst [vmem:[#allocation14_spill] sm:$0xff] %v1943_v12  ;;  %v434_v35 = vmul.f32 %v1918_v7, %v343_v50  ;;  %582 = vperm.xlu1 %1390, %v1619_v26  }
  0xd9   :  { %v1952_v5 = vadd.f32 %v434_v35, %v1780_v55  ;;  %734 = vperm.xlu0 %1406, %v1545_v13   ;;  %v243_v55 = vmul.f32 %v1719_v46, %v1817_v20 }
  0xda   :  { %v1955_v23 = vpop.permute.xlu1 %346  ;;  %v351_v42 = vpop.permute.xlu0 %350 }
  0xdb   :  { %2326 = vst [vmem:[#allocation15_spill] sm:$0xff] %v1952_v5  ;;  %v436_v33 = vmul.f32 %v1918_v7, %v351_v42  ;;  %522 = vperm.xlu1 %1390, %v1521_v9   ;;  %v275_v9 = vadd.f32 %v1728_v51, %v243_v55 }
  0xdd   :  { %v1960_v14 = vadd.f32 %v436_v33, %v1796_v2  ;;  %802 = vperm.xlu0 %1406, %v1655_v32   ;;  %v245_v2 = vmul.f32 %v1719_v46, %v1826_v52 }
  0xde   :  { %v355_v53 = vpop.permute.xlu1 %354  ;;  %v1963_v50 = vpop.permute.xlu0 %358 }
  0xdf   :  { %2327 = vst [vmem:[#allocation16_spill] sm:$0xff] %v1960_v14  ;;  %1391 = vset.pattern.permute.xlu1 %v2322_v59  ;;  %v277_v12 = vadd.f32 %v1728_v51, %v245_v2  ;;  %v241_v2 = vmul.f32 %v1719_v46, %v1805_v18 }
  0xe0   :  { %394 = vperm.xlu1 %1391, %v1631_v28  }
  0xe2   :  { %v363_v35 = vpop.permute.xlu1 %362  ;;  %v1969_v5 = vpop.permute.xlu0 %366 }
  0xe3   :  { %v439_v42 = vmul.f32 %v1918_v7, %v363_v35 }
  0xe4   :  { %1392 = vset.pattern.permute.xlu1 %v2321_v48 }
  0xe5   :  { %v1976_v33 = vadd.f32 %v439_v42, %v275_v9  ;;  %778 = vperm.xlu1 %1392, %v1619_v26  }
  0xe6   :  { %v371_v20 = vpop.permute.xlu1 %370  ;;  %v1979_v14 = vpop.permute.xlu0 %374 }
  0xe7   :  { %v441_v58 = vmul.f32 %v1918_v7, %v371_v20 }
  0xe9   :  { %v1983_v22 = vadd.f32 %v441_v58, %v277_v12  ;;  %1393 = vset.pattern.permute.xlu1 %v2322_v59  ;;  %v615_v58 = vsub.s32 2, %v1697_v39 }
  0xea   :  { %398 = vperm.xlu1 %1393, %v1626_v27   ;;  %v379_v52 = vpop.permute.xlu0 %378 }
  0xeb   :  { %v443_v55 = vmul.f32 %v1918_v7, %v379_v52  ;;  %v1988_v35 = vpop.permute.xlu1 %486  ;;  %v273_v52 = vadd.f32 %v1728_v51, %v241_v2  ;;  %v2008_v1 = vrot.slane %v1710_v43, %v615_v58 }
  0xed   :  { %v1991_v26 = vadd.f32 %v443_v55, %v1844_v6  ;;  %v811_v6 = vsub.s32 3, %v1697_v39  ;;  %v437_v55 = vmul.f32 %v1918_v7, %v355_v53 }
  0xee   :  { %1394 = vset.pattern.permute.xlu1 %v2321_v48  ;;  %v383_v9 = vpop.permute.xlu0 %382 }
  0xef   :  { %2328 = vst [vmem:[#allocation17_spill] sm:$0xff] %v1991_v26  ;;  %v444_v12 = vmul.f32 %v1918_v7, %v383_v9  ;;  %782 = vperm.xlu1 %1394, %v1614_v25   ;;  %v1999_v42 = vpop.permute.xlu1 %490  ;;  %v469_v39 = vadd.f32 %v437_v55, %v273_v52 }
  0xf1   :  { %v2002_v20 = vadd.f32 %v444_v12, %v1841_v36  ;;  %v2016_v36 = vrot.slane %v1710_v43, %v811_v6 }
  0xf3   :  { %2329 = vst [vmem:[#allocation18_spill] sm:$0xff] %v2002_v20  ;;  %1395 = vset.pattern.permute.xlu1 %v2325_v61  ;;  %v2011_v18 = vpop.permute.xlu1 %554  ;;  %v551_v9 = vpop.permute.xlu0 %550 }
  0xf4   :  { %590 = vperm.xlu1 %1395, %v1631_v28   ;;  %v633_v25 = vmul.f32 %v2008_v1, %v551_v9 }
  0xf6   :  { %v665_v58 = vadd.f32 %v633_v25, %v469_v39 }
  0xf7   :  { %v2018_v12 = vpop.permute.xlu0 %558 }
  0xf8   :  { %530 = vperm.xlu1 %1395, %v1533_v11   ;;  %v747_v53 = vpop.permute.xlu1 %746 }
  0xf9   :  { %v829_v2 = vmul.f32 %v2016_v36, %v747_v53 }
  0xfb   :  { %v2022_v20 = vpop.permute.xlu0 %566  ;;  %v861_v60 = vadd.f32 %v829_v2, %v665_v58 }
  0xfc   :  { %1396 = vset.pattern.permute.xlu1 %v2322_v59  ;;  %v2025_v26 = vpop.permute.xlu1 %686 }
  0xfd   :  { %402 = vperm.xlu1 %1396, %v1643_v30   ;;  %v893_v43 = vmax.f32 %v861_v60, 0.0  ;;  %v431_v60 = vmul.f32 %v1918_v7, %v1938_v34  ;;  %v433_v34 = vmul.f32 %v1918_v7, %v1946_v63  ;;  %v435_v63 = vmul.f32 %v1918_v7, %v1955_v23 }
  0xfe   :  { %v227_v23 = vmul.f32 %v1719_v46, %v1692_v37  ;;  %v229_v37 = vmul.f32 %v1719_v46, %v1715_v45  ;;  %v244_v45 = vmul.f32 %v1719_v46, %v1815_v49  ;;  %v438_v49 = vmul.f32 %v1918_v7, %v1963_v50 }
  0xff   :  { %1311 = vmatprep.mubr.f32.mxu1 %v893_v43  ;;  %v2028_v6 = vpop.permute.xlu0 %514  ;;  %v634_v50 = vmul.f32 %v2008_v1, %v2011_v18 }
 0x101   :  { %1397 = vset.pattern.permute.xlu1 %v2321_v48  ;;  %v2031_v11 = vpop.permute.xlu1 %494 }
 0x102   :  { %786 = vperm.xlu1 %1397, %v1631_v28   ;;  %v463_v28 = vadd.f32 %v431_v60, %v1770_v47  ;;  %v465_v60 = vadd.f32 %v433_v34, %v1783_v56  ;;  %v225_v56 = vmul.f32 %v1719_v46, %v1695_v38  ;;  %v422_v38 = vmul.f32 %v1918_v7, %v1897_v17 }
 0x103   :  { %v2034_v52 = vpop.permute.xlu0 %518  ;;  %v242_v17 = vmul.f32 %v1719_v46, %v1803_v15  ;;  %v261_v15 = vadd.f32 %v1728_v51, %v229_v37 }
 0x105   :  { %v2036_v55 = vpop.permute.xlu1 %498 }
 0x106   :  { %1398 = vset.pattern.permute.xlu1 %v2322_v59 }
 0x107   :  { %406 = vperm.xlu1 %1398, %v1638_v29   ;;  %v2040_v9 = vpop.permute.xlu0 %586 }
 0x108   :  { %2330 = vst [vmem:[#allocation19_spill] sm:$0xff] %v2040_v9 }
 0x109   :  { %v2044_v25 = vpop.permute.xlu1 %562 }
 0x10b   :  { %1399 = vset.pattern.permute.xlu1 %v2321_v48  ;;  %v527_v39 = vpop.permute.xlu0 %526 }
 0x10c   :  { %v627_v53 = vmul.f32 %v2008_v1, %v527_v39  ;;  %790 = vperm.xlu1 %1399, %v1626_v27  }
 0x10e   :  { %v2050_v2 = vadd.f32 %v627_v53, %v463_v28  ;;  %v2052_v58 = vpop.permute.xlu1 %754 }
 0x10f   :  { %v2054_v43 = vpop.permute.xlu0 %594 }
 0x110   :  { %2331 = vst [vmem:[#allocation20_spill] sm:$0xff] %v2054_v43  ;;  %1400 = vset.pattern.permute.xlu1 %v2325_v61  ;;  %v226_v43 = vmul.f32 %v1719_v46, %v1703_v41 }
 0x111   :  { %598 = vperm.xlu1 %1400, %v1643_v30  }
 0x112   :  { %v2060_v9 = vpop.permute.xlu1 %694  ;;  %v258_v41 = vadd.f32 %v1728_v51, %v226_v43 }
 0x113   :  { %v535_v47 = vpop.permute.xlu0 %534 }
 0x114   :  { %v629_v27 = vmul.f32 %v2008_v1, %v535_v47  ;;  %v467_v47 = vadd.f32 %v435_v63, %v1799_v4  ;;  %v257_v4 = vadd.f32 %v1728_v51, %v225_v56  ;;  %v618_v63 = vmul.f32 %v2008_v1, %v1999_v42 }
 0x115   :  { %538 = vperm.xlu1 %1400, %v1545_v13   ;;  %v259_v56 = vadd.f32 %v1728_v51, %v227_v23  ;;  %v423_v42 = vmul.f32 %v1918_v7, %v1903_v57  ;;  %v276_v57 = vadd.f32 %v1728_v51, %v244_v45 }
 0x116   :  { %v2065_v39 = vadd.f32 %v629_v27, %v465_v60  ;;  %v228_v27 = vmul.f32 %v1719_v46, %v1700_v40  ;;  %v421_v40 = vmul.f32 %v1918_v7, %v1900_v21  ;;  %v617_v21 = vmul.f32 %v2008_v1, %v1988_v35 }
 0x117   :  { %v2067_v28 = vpop.permute.xlu1 %502  ;;  %v2069_v53 = vpop.permute.xlu0 %602  ;;  %v274_v35 = vadd.f32 %v1728_v51, %v242_v17 }
 0x118   :  { %2332 = vst [vmem:[#allocation21_spill] sm:$0xff] %v2065_v39  ;;  %2333 = vst [vmem:[#allocation22_spill] sm:$0xff] %v2069_v53  ;;  %v230_v53 = vmul.f32 %v1719_v46, %v1712_v44 }
 0x119   :  { %1401 = vset.pattern.permute.xlu1 %v2322_v59  ;;  %v470_v17 = vadd.f32 %v438_v49, %v274_v35 }
 0x11a   :  { %410 = vperm.xlu1 %1401, %v1655_v32  }
 0x11b   :  { %v2079_v13 = vpop.permute.xlu1 %506  ;;  %v543_v34 = vpop.permute.xlu0 %542 }
 0x11c   :  { %v631_v60 = vmul.f32 %v2008_v1, %v543_v34  ;;  %v262_v34 = vadd.f32 %v1728_v51, %v230_v53  ;;  %v424_v53 = vmul.f32 %v1918_v7, %v1906_v3  ;;  %v425_v3 = vmul.f32 %v1918_v7, %v1911_v8 }
 0x11e   :  { %v2092_v39 = vadd.f32 %v631_v60, %v467_v47  ;;  %1402 = vset.pattern.permute.xlu1 %v2321_v48  ;;  %v454_v47 = vadd.f32 %v422_v38, %v258_v41  ;;  %v814_v60 = vmul.f32 %v2016_v36, %v2025_v26  ;;  %v635_v26 = vmul.f32 %v2008_v1, %v2018_v12 }
 0x11f   :  { %794 = vperm.xlu1 %1402, %v1643_v30   ;;  %v2101_v43 = vpop.permute.xlu1 %570  ;;  %v2103_v44 = vpop.permute.xlu0 %610  ;;  %v260_v30 = vadd.f32 %v1728_v51, %v228_v27  ;;  %v455_v12 = vadd.f32 %v423_v42, %v259_v56  ;;  %v621_v56 = vmul.f32 %v2008_v1, %v2067_v28  ;;  %v637_v28 = vmul.f32 %v2008_v1, %v2022_v20 }
 0x120   :  { %2334 = vst [vmem:[#allocation23_spill] sm:$0xff] %v2092_v39  ;;  %v453_v39 = vadd.f32 %v421_v40, %v257_v4  ;;  %v650_v23 = vadd.f32 %v618_v63, %v454_v47  ;;  %v246_v4 = vmul.f32 %v1719_v46, %v1824_v16  ;;  %v426_v40 = vmul.f32 %v1918_v7, %v1913_v19 }
 0x121   :  { %v456_v18 = vadd.f32 %v424_v53, %v260_v30  ;;  %v667_v45 = vadd.f32 %v635_v26, %v1976_v33  ;;  %v620_v46 = vmul.f32 %v2008_v1, %v2036_v55  ;;  %v457_v33 = vadd.f32 %v425_v3, %v261_v15 }
 0x122   :  { %v649_v38 = vadd.f32 %v617_v21, %v453_v39  ;;  %v846_v37 = vadd.f32 %v814_v60, %v650_v23  ;;  %v619_v39 = vmul.f32 %v2008_v1, %v2031_v11  ;;  %v816_v11 = vmul.f32 %v2016_v36, %v2060_v9 }
 0x123   :  { %1403 = vset.pattern.permute.xlu1 %v2322_v59  ;;  %v458_v55 = vadd.f32 %v426_v40, %v262_v34  ;;  %v440_v60 = vmul.f32 %v1918_v7, %v1969_v5  ;;  %v622_v15 = vmul.f32 %v2008_v1, %v2079_v13  ;;  %v636_v9 = vmul.f32 %v2008_v1, %v2044_v25 }
 0x124   :  { %414 = vperm.xlu1 %1403, %v1650_v31   ;;  %v699_v27 = vpop.permute.xlu1 %698  ;;  %v683_v41 = vpop.permute.xlu0 %682  ;;  %v831_v31 = vmul.f32 %v2016_v36, %v2052_v58  ;;  %v666_v58 = vadd.f32 %v634_v50, %v470_v17  ;;  %v878_v30 = vmax.f32 %v846_v37, 0.0  ;;  %v651_v35 = vadd.f32 %v619_v39, %v455_v12 }
 0x125   :  { %v813_v59 = vmul.f32 %v2016_v36, %v683_v41  ;;  %v817_v42 = vmul.f32 %v2016_v36, %v699_v27  ;;  %v653_v34 = vadd.f32 %v621_v56, %v457_v33  ;;  %v472_v13 = vadd.f32 %v440_v60, %v276_v57 }
 0x126   :  { %v863_v47 = vadd.f32 %v831_v31, %v667_v45  ;;  %v278_v3 = vadd.f32 %v1728_v51, %v246_v4  ;;  %v669_v37 = vadd.f32 %v637_v28, %v1983_v22  ;;  %v638_v40 = vmul.f32 %v2008_v1, %v2101_v43  ;;  %v1408_v51 = vld [vmem:[%s2301_s0 + $0x78] sm:$0xff] }
 0x127   :  { %v845_v63 = vadd.f32 %v813_v59, %v649_v38  ;;  %v442_v59 = vmul.f32 %v1918_v7, %v1979_v14  ;;  %v849_v38 = vadd.f32 %v817_v42, %v653_v34  ;;  %v668_v12 = vadd.f32 %v636_v9, %v472_v13 }
 0x128   :  { %1404 = vset.pattern.permute.xlu1 %v2321_v48  ;;  %v763_v16 = vpop.permute.xlu1 %762  ;;  %v751_v8 = vpop.permute.xlu0 %750  ;;  %v895_v27 = vmax.f32 %v863_v47, 0.0  ;;  %v427_v22 = vmul.f32 %v1918_v7, %v1921_v0 }
 0x129   :  { %v830_v19 = vmul.f32 %v2016_v36, %v751_v8  ;;  %798 = vperm.xlu1 %1404, %v1638_v29   ;;  %v877_v21 = vmax.f32 %v845_v63, 0.0  ;;  %v652_v29 = vadd.f32 %v620_v46, %v456_v18  ;;  %v833_v20 = vmul.f32 %v2016_v36, %v763_v16 }
 0x12a   :  { %v474_v4 = vadd.f32 %v442_v59, %v278_v3  ;;  %v881_v45 = vmax.f32 %v849_v38, 0.0  ;;  %v459_v0 = vadd.f32 %v427_v22, %v1737_v54  ;;  %v429_v54 = vmul.f32 %v1918_v7, %v1930_v24  ;;  %v1410_v24 = vld [vmem:[%s2301_s0 + $0xf8] sm:$0xff]  ;;  %v2336_v3 = vld [vmem:[#allocation19_spill] sm:$0xff] }
 0x12b   :  { %v862_v49 = vadd.f32 %v830_v19, %v666_v58  ;;  %1287 = vmatprep.mubr.f32.mxu0 %v877_v21  ;;  %v848_v41 = vadd.f32 %v816_v11, %v652_v29  ;;  %v865_v14 = vadd.f32 %v833_v20, %v669_v37  ;;  %v624_v11 = vmul.f32 %v2008_v1, %v2028_v6  ;;  %v2335_v20 = vld [vmem:[#allocation17_spill] sm:$0xff] }
 0x12c   :  { %v703_v53 = vpop.permute.xlu1 %702  ;;  %1288 = vmatmul.mubr.f32.vlgmr.msra.gmra.mxu0 %v878_v30  ;;  %v691_v23 = vpop.permute.xlu0 %690  ;;  %v670_v46 = vadd.f32 %v638_v40, %v474_v4  ;;  %v1409_v30 = vld [vmem:[%s2301_s0 + $0x70] sm:$0xff]  ;;  %v625_v29 = vmul.f32 %v2008_v1, %v2034_v52  ;;  %v642_v37 = vmul.f32 %v2008_v1, %v2336_v3 }
 0x12d   :  { %v894_v5 = vmax.f32 %v862_v49, 0.0  ;;  %v815_v26 = vmul.f32 %v2016_v36, %v691_v23  ;;  %1405 = vset.pattern.permute.xlu1 %v2325_v61  ;;  %v818_v50 = vmul.f32 %v2016_v36, %v703_v53  ;;  %v654_v61 = vadd.f32 %v622_v15, %v458_v55 }
 0x12e   :  { %606 = vperm.xlu1 %1405, %v1655_v32   ;;  %v880_v63 = vmax.f32 %v848_v41, 0.0  ;;  %v897_v19 = vmax.f32 %v865_v14, 0.0  ;;  %v461_v23 = vadd.f32 %v429_v54, %v1753_v62 }
 0x12f   :  { %v847_v25 = vadd.f32 %v815_v26, %v651_v35  ;;  %1312 = vmatmul.mubr.f32.vlgmr.msra.gmra.mxu1 %v894_v5  ;;  %v850_v18 = vadd.f32 %v818_v50, %v654_v61  ;;  %v656_v35 = vadd.f32 %v624_v11, %v1926_v10  ;;  %v2340_v11 = vld [vmem:[#allocation6_spill] sm:$0xff] }
 0x130   :  { %1314 = vmatprep.mubr.f32.mxu1 %v895_v27  ;;  %v759_v31 = vpop.permute.xlu0 %758  ;;  %v657_v10 = vadd.f32 %v625_v29, %v461_v23 }
 0x131   :  { %v879_v17 = vmax.f32 %v847_v25, 0.0  ;;  %v832_v32 = vmul.f32 %v2016_v36, %v759_v31  ;;  %v511_v57 = vpop.permute.xlu1 %510  ;;  %v882_v21 = vmax.f32 %v850_v18, 0.0 }
 0x132   :  { %546 = vperm.xlu1 %1405, %v1408_v51   ;;  %v623_v8 = vmul.f32 %v2008_v1, %v511_v57 }
 0x133   :  { %v864_v39 = vadd.f32 %v832_v32, %v668_v12  ;;  %1290 = vmatprep.mubr.f32.mxu0 %v879_v17  ;;  %v2337_v12 = vld [vmem:[#allocation5_spill] sm:$0xff] }
 0x134   :  { %1291 = vmatmul.mubr.f32.gmra.mxu0 %v880_v63  ;;  %v767_v43 = vpop.permute.xlu0 %766  ;;  %v655_v55 = vadd.f32 %v623_v8, %v459_v0  ;;  %v2338_v63 = vld [vmem:[#allocation18_spill] sm:$0xff]  ;;  %v2339_v8 = vld [vmem:[#allocation13_spill] sm:$0xff] }
 0x135   :  { %v896_v16 = vmax.f32 %v864_v39, 0.0  ;;  %v834_v58 = vmul.f32 %v2016_v36, %v767_v43  ;;  %v575_v56 = vpop.permute.xlu1 %574  ;;  %1293 = vmatprep.mubr.f32.mxu0 %v881_v45 }
 0x136   :  { %1407 = vset.pattern.permute.xlu1 %v2321_v48  ;;  %v639_v34 = vmul.f32 %v2008_v1, %v575_v56 }
 0x137   :  { %v866_v33 = vadd.f32 %v834_v58, %v670_v46  ;;  %738 = vperm.xlu1 %1407, %v1409_v30   ;;  %1315 = vmatmul.mubr.f32.gmra.mxu1 %v896_v16 }
 0x138   :  { %1294 = vmatmul.mubr.f32.gmra.mxu0 %v882_v21  ;;  %1317 = vmatprep.mubr.f32.mxu1 %v897_v19  ;;  %v707_v47 = vpop.permute.xlu0 %706  ;;  %v671_v50 = vadd.f32 %v639_v34, %v2335_v20 }
 0x139   :  { %v898_v60 = vmax.f32 %v866_v33, 0.0  ;;  %v819_v42 = vmul.f32 %v2016_v36, %v707_v47  ;;  %v579_v48 = vpop.permute.xlu1 %578 }
 0x13a   :  { %v640_v31 = vmul.f32 %v2008_v1, %v579_v48 }
 0x13b   :  { %v851_v49 = vadd.f32 %v819_v42, %v655_v55  ;;  %742 = vperm.xlu1 %1407, %v1408_v51   ;;  %1318 = vmatmul.mubr.f32.gmra.mxu1 %v898_v60 }
 0x13c   :  { %v711_v28 = vpop.permute.xlu0 %710  ;;  %v672_v14 = vadd.f32 %v640_v31, %v2338_v63 }
 0x13d   :  { %v883_v15 = vmax.f32 %v851_v49, 0.0  ;;  %v820_v6 = vmul.f32 %v2016_v36, %v711_v28 }
 0x13e   :  { %v387_v53 = vpop.permute.xlu1 %386 }
 0x13f   :  { %v852_v9 = vadd.f32 %v820_v6, %v656_v35  ;;  %806 = vperm.xlu1 %1407, %v1410_v24   ;;  %1296 = vmatprep.mubr.f32.mxu0 %v883_v15  ;;  %v445_v19 = vmul.f32 %v1918_v7, %v387_v53  ;;  %v2341_v35 = vld [vmem:[#allocation20_spill] sm:$0xff]  ;;  %v2342_v15 = vld [vmem:[#allocation7_spill] sm:$0xff] }
 0x140   :  { %v715_v5 = vpop.permute.xlu0 %714  ;;  %v644_v29 = vmul.f32 %v2008_v1, %v2341_v35 }
 0x141   :  { %v884_v26 = vmax.f32 %v852_v9, 0.0  ;;  %v821_v52 = vmul.f32 %v2016_v36, %v715_v5  ;;  %v477_v55 = vadd.f32 %v445_v19, %v2340_v11 }
 0x143   :  { %v853_v27 = vadd.f32 %v821_v52, %v657_v10  ;;  %v771_v41 = vpop.permute.xlu1 %770  ;;  %1297 = vmatmul.mubr.f32.gmra.mxu0 %v884_v26 }
 0x144   :  { %v835_v62 = vmul.f32 %v2016_v36, %v771_v41  ;;  %v719_v17 = vpop.permute.xlu0 %718 }
 0x145   :  { %v885_v13 = vmax.f32 %v853_v27, 0.0  ;;  %v822_v46 = vmul.f32 %v2016_v36, %v719_v17 }
 0x146   :  { %v867_v59 = vadd.f32 %v835_v62, %v671_v50  ;;  %v2343_v50 = vld [vmem:[#allocation14_spill] sm:$0xff] }
 0x147   :  { %1299 = vmatprep.mubr.f32.mxu0 %v885_v13  ;;  %v2344_v13 = vld [vmem:[#allocation21_spill] sm:$0xff] }
 0x148   :  { %v899_v38 = vmax.f32 %v867_v59, 0.0  ;;  %v391_v25 = vpop.permute.xlu1 %390  ;;  %v723_v45 = vpop.permute.xlu0 %722 }
 0x149   :  { %v446_v61 = vmul.f32 %v1918_v7, %v391_v25  ;;  %v823_v39 = vmul.f32 %v2016_v36, %v723_v45  ;;  %v2347_v45 = vld [vmem:[#allocation9_spill] sm:$0xff] }
 0x14a   :  { %1320 = vmatprep.mubr.f32.mxu1 %v899_v38 }
 0x14b   :  { %v478_v40 = vadd.f32 %v446_v61, %v2337_v12  ;;  %v855_v56 = vadd.f32 %v823_v39, %v2050_v2  ;;  %v2345_v12 = vld [vmem:[#allocation8_spill] sm:$0xff] }
 0x14c   :  { %v727_v53 = vpop.permute.xlu0 %726 }
 0x14d   :  { %v775_v32 = vpop.permute.xlu1 %774  ;;  %v674_v57 = vadd.f32 %v642_v37, %v478_v40  ;;  %v887_v47 = vmax.f32 %v855_v56, 0.0  ;;  %v824_v41 = vmul.f32 %v2016_v36, %v727_v53 }
 0x14e   :  { %v836_v18 = vmul.f32 %v2016_v36, %v775_v32 }
 0x150   :  { %v868_v51 = vadd.f32 %v836_v18, %v672_v14  ;;  %v731_v26 = vpop.permute.xlu0 %730 }
 0x151   :  { %v825_v52 = vmul.f32 %v2016_v36, %v731_v26 }
 0x152   :  { %v900_v22 = vmax.f32 %v868_v51, 0.0  ;;  %v583_v4 = vpop.permute.xlu1 %582 }
 0x153   :  { %v641_v33 = vmul.f32 %v2008_v1, %v583_v4  ;;  %v857_v59 = vadd.f32 %v825_v52, %v2344_v13 }
 0x154   :  { %1321 = vmatmul.mubr.f32.gmra.mxu1 %v900_v22  ;;  %v2346_v22 = vld [vmem:[#allocation22_spill] sm:$0xff] }
 0x155   :  { %v673_v42 = vadd.f32 %v641_v33, %v477_v55  ;;  %v889_v31 = vmax.f32 %v857_v59, 0.0  ;;  %v646_v4 = vmul.f32 %v2008_v1, %v2346_v22 }
 0x156   :  { %v523_v43 = vpop.permute.xlu1 %522 }
 0x157   :  { %v626_v16 = vmul.f32 %v2008_v1, %v523_v43 }
 0x159   :  { %v658_v58 = vadd.f32 %v626_v16, %v2339_v8 }
 0x15b   :  { %v395_v21 = vpop.permute.xlu1 %394  ;;  %v854_v0 = vadd.f32 %v822_v46, %v658_v58 }
 0x15c   :  { %v447_v38 = vmul.f32 %v1918_v7, %v395_v21 }
 0x15d   :  { %v886_v30 = vmax.f32 %v854_v0, 0.0  ;;  %v735_v0 = vpop.permute.xlu0 %734 }
 0x15e   :  { %v479_v40 = vadd.f32 %v447_v38, %v2345_v12  ;;  %v826_v33 = vmul.f32 %v2016_v36, %v735_v0 }
 0x15f   :  { %1300 = vmatmul.mubr.f32.gmra.mxu0 %v886_v30  ;;  %v2348_v30 = vld [vmem:[#allocation15_spill] sm:$0xff] }
 0x160   :  { %v779_v60 = vpop.permute.xlu1 %778  ;;  %1302 = vmatprep.mubr.f32.mxu0 %v887_v47 }
 0x161   :  { %v837_v48 = vmul.f32 %v2016_v36, %v779_v60 }
 0x163   :  { %v869_v54 = vadd.f32 %v837_v48, %v673_v42 }
 0x165   :  { %v901_v49 = vmax.f32 %v869_v54, 0.0  ;;  %v399_v28 = vpop.permute.xlu1 %398  ;;  %v2349_v54 = vld [vmem:[#allocation10_spill] sm:$0xff] }
 0x166   :  { %v448_v2 = vmul.f32 %v1918_v7, %v399_v28 }
 0x167   :  { %1323 = vmatprep.mubr.f32.mxu1 %v901_v49 }
 0x168   :  { %v480_v6 = vadd.f32 %v448_v2, %v2342_v15 }
 0x16a   :  { %v783_v23 = vpop.permute.xlu1 %782  ;;  %v676_v9 = vadd.f32 %v644_v29, %v480_v6 }
 0x16b   :  { %v838_v24 = vmul.f32 %v2016_v36, %v783_v23  ;;  %v648_v23 = vmul.f32 %v2008_v1, %v2103_v44 }
 0x16d   :  { %v870_v34 = vadd.f32 %v838_v24, %v674_v57 }
 0x16f   :  { %v902_v5 = vmax.f32 %v870_v34, 0.0  ;;  %v591_v10 = vpop.permute.xlu1 %590 }
 0x170   :  { %v643_v37 = vmul.f32 %v2008_v1, %v591_v10 }
 0x171   :  { %1324 = vmatmul.mubr.f32.gmra.mxu1 %v902_v5 }
 0x172   :  { %v675_v32 = vadd.f32 %v643_v37, %v479_v40 }
 0x173   :  { %v531_v27 = vpop.permute.xlu1 %530 }
 0x174   :  { %v628_v20 = vmul.f32 %v2008_v1, %v531_v27  ;;  %v803_v27 = vpop.permute.xlu0 %802 }
 0x175   :  { %v843_v59 = vmul.f32 %v2016_v36, %v803_v27 }
 0x176   :  { %v660_v62 = vadd.f32 %v628_v20, %v2343_v50  ;;  %v2351_v50 = vld [vmem:[#allocation12_spill] sm:$0xff] }
 0x178   :  { %v403_v25 = vpop.permute.xlu1 %402  ;;  %v856_v3 = vadd.f32 %v824_v41, %v660_v62 }
 0x179   :  { %v449_v11 = vmul.f32 %v1918_v7, %v403_v25 }
 0x17a   :  { %v888_v61 = vmax.f32 %v856_v3, 0.0 }
 0x17b   :  { %v481_v49 = vadd.f32 %v449_v11, %v2349_v54 }
 0x17c   :  { %1303 = vmatmul.mubr.f32.gmra.mxu0 %v888_v61 }
 0x17d   :  { %v787_v17 = vpop.permute.xlu1 %786  ;;  %1305 = vmatprep.mubr.f32.mxu0 %v889_v31  ;;  %v2352_v31 = vld [vmem:[#allocation23_spill] sm:$0xff] }
 0x17e   :  { %v839_v57 = vmul.f32 %v2016_v36, %v787_v17  ;;  %v2353_v17 = vld [vmem:[#allocation16_spill] sm:$0xff] }
 0x180   :  { %v871_v63 = vadd.f32 %v839_v57, %v675_v32 }
 0x182   :  { %v903_v14 = vmax.f32 %v871_v63, 0.0  ;;  %v407_v18 = vpop.permute.xlu1 %406 }
 0x183   :  { %v450_v51 = vmul.f32 %v1918_v7, %v407_v18 }
 0x184   :  { %1326 = vmatprep.mubr.f32.mxu1 %v903_v14 }
 0x185   :  { %v482_v39 = vadd.f32 %v450_v51, %v2347_v45 }
 0x187   :  { %v791_v43 = vpop.permute.xlu1 %790  ;;  %v678_v46 = vadd.f32 %v646_v4, %v482_v39 }
 0x188   :  { %v840_v16 = vmul.f32 %v2016_v36, %v791_v43 }
 0x18a   :  { %v872_v8 = vadd.f32 %v840_v16, %v676_v9  ;;  %v2350_v9 = vld [vmem:[#allocation11_spill] sm:$0xff] }
 0x18c   :  { %v904_v58 = vmax.f32 %v872_v8, 0.0  ;;  %v599_v56 = vpop.permute.xlu1 %598 }
 0x18d   :  { %v645_v42 = vmul.f32 %v2008_v1, %v599_v56 }
 0x18e   :  { %1327 = vmatmul.mubr.f32.gmra.mxu1 %v904_v58 }
 0x18f   :  { %v677_v2 = vadd.f32 %v645_v42, %v481_v49 }
 0x190   :  { %v539_v19 = vpop.permute.xlu1 %538 }
 0x191   :  { %v630_v21 = vmul.f32 %v2008_v1, %v539_v19 }
 0x193   :  { %v662_v47 = vadd.f32 %v630_v21, %v2348_v30 }
 0x195   :  { %v411_v55 = vpop.permute.xlu1 %410  ;;  %v858_v60 = vadd.f32 %v826_v33, %v662_v47 }
 0x196   :  { %v451_v26 = vmul.f32 %v1918_v7, %v411_v55 }
 0x197   :  { %v890_v48 = vmax.f32 %v858_v60, 0.0 }
 0x198   :  { %v483_v62 = vadd.f32 %v451_v26, %v2351_v50 }
 0x199   :  { %1306 = vmatmul.mubr.f32.gmra.mxu0 %v890_v48 }
 0x19a   :  { %v795_v28 = vpop.permute.xlu1 %794 }
 0x19b   :  { %v841_v35 = vmul.f32 %v2016_v36, %v795_v28 }
 0x19d   :  { %v873_v29 = vadd.f32 %v841_v35, %v677_v2 }
 0x19f   :  { %v905_v15 = vmax.f32 %v873_v29, 0.0  ;;  %v415_v6 = vpop.permute.xlu1 %414 }
 0x1a0   :  { %v452_v53 = vmul.f32 %v1918_v7, %v415_v6 }
 0x1a1   :  { %1329 = vmatprep.mubr.f32.mxu1 %v905_v15 }
 0x1a2   :  { %v484_v24 = vadd.f32 %v452_v53, %v2350_v9 }
 0x1a4   :  { %v799_v34 = vpop.permute.xlu1 %798  ;;  %v680_v5 = vadd.f32 %v648_v23, %v484_v24 }
 0x1a5   :  { %v842_v10 = vmul.f32 %v2016_v36, %v799_v34 }
 0x1a7   :  { %v874_v52 = vadd.f32 %v842_v10, %v678_v46 }
 0x1a9   :  { %v906_v41 = vmax.f32 %v874_v52, 0.0  ;;  %v607_v20 = vpop.permute.xlu1 %606 }
 0x1aa   :  { %v647_v13 = vmul.f32 %v2008_v1, %v607_v20 }
 0x1ab   :  { %1330 = vmatmul.mubr.f32.gmra.mxu1 %v906_v41 }
 0x1ac   :  { %v679_v44 = vadd.f32 %v647_v13, %v483_v62 }
 0x1ad   :  { %v547_v38 = vpop.permute.xlu1 %546 }
 0x1ae   :  { %v875_v25 = vadd.f32 %v843_v59, %v679_v44  ;;  %v632_v61 = vmul.f32 %v2008_v1, %v547_v38  ;;  %v2264_v1 = vld [vmem:[%s2305_s4] ss:$0 sm:$0xff]  ;;  %s1437_s4 = smov [#allocation2]  }
 0x1af   :  { %s1194_s20 = sshll.u32 %s1437_s4, 4  ;;  %s1195_s20 = int_to_ptr.vmem [resolvable:$true] %s1194_s20 }
 0x1b0   :  { %v907_v3 = vmax.f32 %v875_v25, 0.0  ;;  %v664_v32 = vadd.f32 %v632_v61, %v2353_v17  ;;  %s1411_s21 = scalar_lea.vmem %s1195_s20, 4096  ;;  %p1416_p1 = scmp.lt.s32.totalorder %s1195_s20, %s1195_s20 }
 0x1b1   :  { %p1412_p0 = scmp.ne.s32.totalorder %s1195_s20, %s1411_s21  ;;  %p1417_p2 = scmp.lt.s32.totalorder %s1411_s21, %s1411_s21 }
 0x1b2   :  { %v739_v37 = vpop.permute.xlu1 %738  ;;  %1332 = vmatprep.mubr.f32.mxu1 %v907_v3 }
 0x1b3   :  { %v827_v7 = vmul.f32 %v2016_v36, %v739_v37  ;;  %p1418_p3 = por %p1417_p2, %p1416_p1 }
 0x1b5   :  { %v859_v12 = vadd.f32 %v827_v7, %v2352_v31  ;;  %p1419_p4 = pnand %p1418_p3, %p1412_p0 }
 0x1b6   :  { %v743_v40 = vpop.permute.xlu1 %742 }
 0x1b7   :  { %v891_v57 = vmax.f32 %v859_v12, 0.0  ;;  %v828_v63 = vmul.f32 %v2016_v36, %v743_v40 }
 0x1b9   :  { %v860_v14 = vadd.f32 %v828_v63, %v664_v32  ;;  %1308 = vmatprep.mubr.f32.mxu0 %v891_v57 }
 0x1ba   :  { %v807_v18 = vpop.permute.xlu1 %806 }
 0x1bb   :  { %v892_v51 = vmax.f32 %v860_v14, 0.0  ;;  %v844_v22 = vmul.f32 %v2016_v36, %v807_v18 }
 0x1bd   :  { %v876_v4 = vadd.f32 %v844_v22, %v680_v5  ;;  %1309 = vmatmul.mubr.f32.gmra.mxu0 %v892_v51 }
 0x1bf   :  { %v908_v45 = vmax.f32 %v876_v4, 0.0 }
 0x1c1   :  { %1333 = vmatmul.mubr.f32.gmra.mxu1 %v908_v45 }
 0x1ec   :  { %v1289_v39 = vpop.f32.mrf.mxu0 }
 0x1ed   :  { %v1004_v43 = vadd.f32 %v1289_v39, %v2264_v1 }
 0x1ee   :  { %v998_v46 = vpop.f32.mrf.mxu0 }
 0x1ef   :  { %1158 = vst [vmem:[#allocation2 + $0x8] sm:$0xff] %v1004_v43  ;;  %v999_v16 = vadd.f32 %v2264_v1, %v998_v46  ;;  %v1313_v8 = vpop.f32.mrf.mxu1 }
 0x1f0   :  { %v1084_v58 = vadd.f32 %v1313_v8, %v2264_v1 }
 0x1f1   :  { %1157 = vst [vmem:[#allocation2] sm:$0xff] %v999_v16  ;;  %v1078_v36 = vpop.f32.mrf.mxu1 }
 0x1f2   :  { %1174 = vst [vmem:[#allocation2 + $0x88] sm:$0xff] %v1084_v58  ;;  %v1079_v56 = vadd.f32 %v2264_v1, %v1078_v36 }
 0x1f4   :  { %1173 = vst [vmem:[#allocation2 + $0x80] sm:$0xff] %v1079_v56  ;;  %v1292_v19 = vpop.f32.mrf.mxu0 }
 0x1f5   :  { %v1014_v21 = vadd.f32 %v1292_v19, %v2264_v1 }
 0x1f6   :  { %v1008_v0 = vpop.f32.mrf.mxu0 }
 0x1f7   :  { %1160 = vst [vmem:[#allocation2 + $0x18] sm:$0xff] %v1014_v21  ;;  %v1009_v33 = vadd.f32 %v2264_v1, %v1008_v0  ;;  %v1316_v30 = vpop.f32.mrf.mxu1 }
 0x1f8   :  { %v1094_v47 = vadd.f32 %v1316_v30, %v2264_v1  ;;  %v1295_v11 = vpop.f32.mrf.mxu0 }
 0x1f9   :  { %1159 = vst [vmem:[#allocation2 + $0x10] sm:$0xff] %v1009_v33  ;;  %v1024_v55 = vadd.f32 %v1295_v11, %v2264_v1  ;;  %v1088_v60 = vpop.f32.mrf.mxu1 }
 0x1fa   :  { %1176 = vst [vmem:[#allocation2 + $0x98] sm:$0xff] %v1094_v47  ;;  %v1089_v42 = vadd.f32 %v2264_v1, %v1088_v60  ;;  %v1018_v48 = vpop.f32.mrf.mxu0 }
 0x1fb   :  { %1162 = vst [vmem:[#allocation2 + $0x28] sm:$0xff] %v1024_v55  ;;  %v1019_v54 = vadd.f32 %v2264_v1, %v1018_v48  ;;  %v1319_v49 = vpop.f32.mrf.mxu1 }
 0x1fc   :  { %1175 = vst [vmem:[#allocation2 + $0x90] sm:$0xff] %v1089_v42  ;;  %v1104_v28 = vadd.f32 %v1319_v49, %v2264_v1 }
 0x1fd   :  { %1161 = vst [vmem:[#allocation2 + $0x20] sm:$0xff] %v1019_v54  ;;  %v1098_v2 = vpop.f32.mrf.mxu1 }
 0x1fe   :  { %1178 = vst [vmem:[#allocation2 + $0xa8] sm:$0xff] %v1104_v28  ;;  %v1099_v35 = vadd.f32 %v2264_v1, %v1098_v2 }
 0x200   :  { %1177 = vst [vmem:[#allocation2 + $0xa0] sm:$0xff] %v1099_v35 }
 0x203   :  { %v1298_v29 = vpop.f32.mrf.mxu0 }
 0x204   :  { %v1034_v15 = vadd.f32 %v1298_v29, %v2264_v1 }
 0x205   :  { %v1028_v6 = vpop.f32.mrf.mxu0 }
 0x206   :  { %1164 = vst [vmem:[#allocation2 + $0x38] sm:$0xff] %v1034_v15  ;;  %v1029_v53 = vadd.f32 %v2264_v1, %v1028_v6 }
 0x208   :  { %1163 = vst [vmem:[#allocation2 + $0x30] sm:$0xff] %v1029_v53 }
 0x214   :  { %v1322_v23 = vpop.f32.mrf.mxu1 }
 0x215   :  { %v1114_v9 = vadd.f32 %v1322_v23, %v2264_v1 }
 0x216   :  { %v1108_v24 = vpop.f32.mrf.mxu1 }
 0x217   :  { %1180 = vst [vmem:[#allocation2 + $0xb8] sm:$0xff] %v1114_v9  ;;  %v1109_v34 = vadd.f32 %v2264_v1, %v1108_v24 }
 0x219   :  { %1179 = vst [vmem:[#allocation2 + $0xb0] sm:$0xff] %v1109_v34 }
 0x21f   :  { %v1301_v5 = vpop.f32.mrf.mxu0 }
 0x220   :  { %v1044_v10 = vadd.f32 %v1301_v5, %v2264_v1 }
 0x221   :  { %v1038_v26 = vpop.f32.mrf.mxu0 }
 0x222   :  { %1166 = vst [vmem:[#allocation2 + $0x48] sm:$0xff] %v1044_v10  ;;  %v1039_v52 = vadd.f32 %v2264_v1, %v1038_v26 }
 0x224   :  { %1165 = vst [vmem:[#allocation2 + $0x40] sm:$0xff] %v1039_v52 }
 0x231   :  { %v1325_v27 = vpop.f32.mrf.mxu1 }
 0x232   :  { %v1124_v41 = vadd.f32 %v1325_v27, %v2264_v1 }
 0x233   :  { %v1118_v20 = vpop.f32.mrf.mxu1 }
 0x234   :  { %1182 = vst [vmem:[#allocation2 + $0xc8] sm:$0xff] %v1124_v41  ;;  %v1119_v50 = vadd.f32 %v2264_v1, %v1118_v20 }
 0x236   :  { %1181 = vst [vmem:[#allocation2 + $0xc0] sm:$0xff] %v1119_v50 }
 0x23c   :  { %v1304_v62 = vpop.f32.mrf.mxu0 }
 0x23d   :  { %v1054_v13 = vadd.f32 %v1304_v62, %v2264_v1 }
 0x23e   :  { %v1048_v59 = vpop.f32.mrf.mxu0 }
 0x23f   :  { %1168 = vst [vmem:[#allocation2 + $0x58] sm:$0xff] %v1054_v13  ;;  %v1049_v44 = vadd.f32 %v2264_v1, %v1048_v59 }
 0x241   :  { %1167 = vst [vmem:[#allocation2 + $0x50] sm:$0xff] %v1049_v44 }
 0x24e   :  { %v1328_v38 = vpop.f32.mrf.mxu1 }
 0x24f   :  { %v1134_v25 = vadd.f32 %v1328_v38, %v2264_v1 }
 0x250   :  { %v1128_v3 = vpop.f32.mrf.mxu1 }
 0x251   :  { %1184 = vst [vmem:[#allocation2 + $0xd8] sm:$0xff] %v1134_v25  ;;  %v1129_v37 = vadd.f32 %v2264_v1, %v1128_v3 }
 0x253   :  { %1183 = vst [vmem:[#allocation2 + $0xd0] sm:$0xff] %v1129_v37 }
 0x259   :  { %v1307_v61 = vpop.f32.mrf.mxu0 }
 0x25a   :  { %v1064_v7 = vadd.f32 %v1307_v61, %v2264_v1 }
 0x25b   :  { %v1058_v31 = vpop.f32.mrf.mxu0 }
 0x25c   :  { %1170 = vst [vmem:[#allocation2 + $0x68] sm:$0xff] %v1064_v7  ;;  %v1059_v12 = vadd.f32 %v2264_v1, %v1058_v31 }
 0x25e   :  { %1169 = vst [vmem:[#allocation2 + $0x60] sm:$0xff] %v1059_v12 }
 0x26b   :  { %v1331_v40 = vpop.f32.mrf.mxu1 }
 0x26c   :  { %v1144_v17 = vadd.f32 %v1331_v40, %v2264_v1 }
 0x26d   :  { %v1138_v32 = vpop.f32.mrf.mxu1 }
 0x26e   :  { %1186 = vst [vmem:[#allocation2 + $0xe8] sm:$0xff] %v1144_v17  ;;  %v1139_v57 = vadd.f32 %v2264_v1, %v1138_v32 }
 0x270   :  { %1185 = vst [vmem:[#allocation2 + $0xe0] sm:$0xff] %v1139_v57 }
 0x27d   :  { %v1310_v63 = vpop.f32.mrf.mxu0 }
 0x27e   :  { %v1074_v14 = vadd.f32 %v1310_v63, %v2264_v1 }
 0x27f   :  { %v1068_v18 = vpop.f32.mrf.mxu0 }
 0x280   :  { %1172 = vst [vmem:[#allocation2 + $0x78] sm:$0xff] %v1074_v14  ;;  %v1069_v51 = vadd.f32 %v2264_v1, %v1068_v18 }
 0x281   :  { %v1334_v22 = vpop.f32.mrf.mxu1 }
 0x282   :  { %1171 = vst [vmem:[#allocation2 + $0x70] sm:$0xff] %v1069_v51  ;;  %v1154_v4 = vadd.f32 %v1334_v22, %v2264_v1 }
 0x283   :  { %v1148_v45 = vpop.f32.mrf.mxu1 }
 0x284   :  { %1188 = vst [vmem:[#allocation2 + $0xf8] sm:$0xff] %v1154_v4  ;;  %v1149_v39 = vadd.f32 %v2264_v1, %v1148_v45 }
 0x286   :  { %1187 = vst [vmem:[#allocation2 + $0xf0] sm:$0xff] %v1149_v39 }
 0x287   :  { %1422 = shalt.err (!%p1419_p4)
}
 0x288   :  { %s1438_s22 = smov 128   ;;  %s1439_s23 = smov 8  }
 0x289   :  { %1200 = dma.vmem_to_hbm [thread:$0]  %s1195_s20, 4096, %s2306_s5, [#allocation3], %s1438_s22, %s1438_s22, %s1439_s23  }
 0x28a   :  { %1431 = dma.done.wait [#allocation3], 4096  }
 0x28b   :  { %1432 = vsyncadd [#allocation3], 4294963200 }
 0x28c   :  { %1204 = vsyncpa [#allocation3], 1 }

</bundles_post_ra>
